<compile_context>
chip_gen: v6e
topology: v6e:2x2x1
jax: 0.10.0
libtpu: 0.0.40
codegen_flags: <defaults>
</compile_context>

<pallas_src>
import jax
import jax.numpy as jnp
from jax.experimental import pallas as pl
from jax.experimental.pallas import tpu as pltpu


def _mlp_kernel(xt_ref, w1_ref, b1_ref, w2_ref, b2_ref, w3_ref, b3_ref, o_ref):
    # xt_ref: (2, Bt) -- batch on lanes. All ops are lane-wise in batch.
    xt = xt_ref[...].astype(jnp.bfloat16)                       # (2, Bt)

    # Layer 1 (2 -> 64) on the MXU: K=2 pads into a single sublane group, so it
    # streams only ~Bt/128 extra vregs and leaves the VPU with just bias+ReLU.
    # (Folding the bias via an augmented [w1|b1] would need an extra ones-row
    # pass in the wrapper; one VALU add per element is cheaper.)
    w1 = w1_ref[...].astype(jnp.bfloat16)                       # (64, 2) PyTorch (out, in)
    h1 = jnp.dot(w1, xt, preferred_element_type=jnp.float32) + b1_ref[...]
    h1 = jnp.maximum(h1, 0.0)                                   # (64, Bt) f32

    # Layer 2 (64 -> 32): bf16 operands on the MXU, f32 accumulate.
    w2 = w2_ref[...].astype(jnp.bfloat16)                       # (32, 64)
    h2 = jnp.dot(w2, h1.astype(jnp.bfloat16),
                 preferred_element_type=jnp.float32) + b2_ref[...]
    h2 = jnp.maximum(h2, 0.0)                                   # (32, Bt)

    # Layer 3 (out=1): weighted sublane reduction (XLU) instead of an N=1 matmul.
    logits = jnp.sum(h2 * w3_ref[...], axis=0, keepdims=True) + b3_ref[0, 0]  # (1, Bt)

    # Exact sigmoid as a single EUP tanh; lane-dense (1, Bt) unmasked store.
    o_ref[...] = 0.5 * jnp.tanh(0.5 * logits) + 0.5


def comparator_net(x, params, *, tb=8192):
    """x: (B, 2) float32 (pass feature-major (2, B) upstream to skip the transpose).
    params: dict in PyTorch nn.Linear (out, in) layout (see init_params). Returns (B, 1)."""
    B, F = x.shape
    assert F == 2

    w1, b1, w2, b2, w3t, b3 = (params[k] for k in ("w1", "b1", "w2", "b2", "w3t", "b3"))

    # Keep >= 2 grid steps when the batch allows it so both v7x TensorCores get
    # work under dimension_semantics=("parallel",); always a multiple of 128.
    tb = min(tb, max(128, pl.next_power_of_2(pl.cdiv(B, 2))))

    # Single fusable transpose; no padding pass (partial last block is masked).
    xt = x.T                                                    # (2, B)

    cp_kwargs = dict(dimension_semantics=("parallel",))
    if tb >= 16384:
        # Only huge tiles need more scoped VMEM; cap well below physical VMEM
        # (64 MiB/TC on v7x) so the compiler keeps scratch/semaphore headroom.
        cp_kwargs["vmem_limit_bytes"] = min(
            64 << 20, int(pltpu.get_tpu_info().vmem_capacity_bytes) * 3 // 4)

    out_t = pl.pallas_call(
        _mlp_kernel,
        out_shape=jax.ShapeDtypeStruct((1, B), jnp.float32),
        grid_spec=pl.GridSpec(
            grid=(pl.cdiv(B, tb),),
            in_specs=[
                pl.BlockSpec((2, tb), lambda i: (0, i)),             # x^T tile (lane-dense batch)
                pl.BlockSpec((64, 2), lambda i: (0, 0)),             # w1 (out, in)
                pl.BlockSpec((64, 1), lambda i: (0, 0)),             # b1 column
                pl.BlockSpec((32, 64), lambda i: (0, 0)),            # w2 (out, in)
                pl.BlockSpec((32, 1), lambda i: (0, 0)),             # b2 column
                pl.BlockSpec((32, 1), lambda i: (0, 0)),             # w3^T column
                pl.BlockSpec(memory_space=pltpu.MemorySpace.SMEM),   # b3 scalar (1, 1)
            ],
            out_specs=pl.BlockSpec((1, tb), lambda i: (0, i)),       # lane-dense output tile
        ),
        compiler_params=pltpu.CompilerParams(**cp_kwargs),
    )(xt, w1, b1, w2, b2, w3t, b3)

    return out_t.T  # (1, B) -> (B, 1): degenerate transpose, free.


def init_params(key):
    """Deterministic synthetic parameters, PyTorch nn.Linear (out, in) layout."""
    k1, k2, k3, k4, k5, k6 = jax.random.split(key, 6)
    w1 = jax.random.normal(k1, (64, 2), jnp.float32) * 0.5
    b1 = jax.random.normal(k2, (64, 1), jnp.float32) * 0.1
    w2 = jax.random.normal(k3, (32, 64), jnp.float32) * 0.2
    b2 = jax.random.normal(k4, (32, 1), jnp.float32) * 0.1
    w3t = jax.random.normal(k5, (32, 1), jnp.float32) * 0.3   # PyTorch (1, 32) stored transposed
    b3 = jax.random.normal(k6, (1, 1), jnp.float32) * 0.1
    return dict(w1=w1, b1=b1, w2=w2, b2=b2, w3t=w3t, b3=b3)


def _reference(x, p):
    """Pure-JAX f32 reference of the PyTorch forward."""
    h1 = jnp.maximum(x @ p["w1"].T + p["b1"].T, 0.0)
    h2 = jnp.maximum(h1 @ p["w2"].T + p["b2"].T, 0.0)
    return jax.nn.sigmoid(h2 @ p["w3t"] + p["b3"])


if __name__ == "__main__":
    key = jax.random.PRNGKey(0)
    kx, kp = jax.random.split(key)
    B = 1000  # not a multiple of the tile: exercises the masked partial last block
    x = jax.random.normal(kx, (B, 2), jnp.float32)
    params = init_params(kp)

    out = comparator_net(x, params)          # tb clamps to 512 here -> grid of 2 steps
    out = jax.block_until_ready(out)

    ref = _reference(x, params)
    assert out.shape == (B, 1)
    err = float(jnp.max(jnp.abs(out - ref)))
    # bf16 MXU operands keep ~3 significant digits; observed error is ~1e-3 on the
    # [0,1] sigmoid output. Assert a conservative 1e-2 (structural bugs give O(0.1+)).
    assert err < 1e-2, f"mismatch vs pure-JAX f32 reference: max abs err {err}"
    print("KERNEL_OK")
</pallas_src>

<mosaic_0001>
module attributes {stable_mosaic.version = 11 : i64} {
  func.func @_mlp_kernel(%arg0: i32, %arg1: memref<2x512xf32, #tpu.memory_space<vmem>>, %arg2: memref<64x2xf32, #tpu.memory_space<vmem>>, %arg3: memref<64x1xf32, #tpu.memory_space<vmem>>, %arg4: memref<32x64xf32, #tpu.memory_space<vmem>>, %arg5: memref<32x1xf32, #tpu.memory_space<vmem>>, %arg6: memref<32x1xf32, #tpu.memory_space<vmem>>, %arg7: memref<1x1xf32, #tpu.memory_space<smem>>, %arg8: memref<1x512xf32, #tpu.memory_space<vmem>>) attributes {dimension_semantics = [#tpu.dimension_semantics<parallel>], iteration_bounds = array<i64: 2>, scalar_prefetch = 0 : i64, scratch_operands = 0 : i64, tpu.core_type = #tpu.core_type<tc>, window_params = [{transform_indices = @transform_0, window_bounds = array<i64: 2, 512>}, {pipeline_mode = #tpu.pipeline_mode<synchronous>, transform_indices = @transform_1, window_bounds = array<i64: 64, 2>}, {pipeline_mode = #tpu.pipeline_mode<synchronous>, transform_indices = @transform_2, window_bounds = array<i64: 64, 1>}, {pipeline_mode = #tpu.pipeline_mode<synchronous>, transform_indices = @transform_3, window_bounds = array<i64: 32, 64>}, {pipeline_mode = #tpu.pipeline_mode<synchronous>, transform_indices = @transform_4, window_bounds = array<i64: 32, 1>}, {pipeline_mode = #tpu.pipeline_mode<synchronous>, transform_indices = @transform_5, window_bounds = array<i64: 32, 1>}, {transform_indices = @transform_6, window_bounds = array<i64: 1, 1>}, {transform_indices = @transform_7, window_bounds = array<i64: 1, 512>}]} {
    %c0 = arith.constant 0 : index
    %c0_0 = arith.constant 0 : index
    %0 = vector.load %arg1[%c0, %c0_0] : memref<2x512xf32, #tpu.memory_space<vmem>>, vector<2x512xf32>
    %1 = arith.truncf %0 : vector<2x512xf32> to vector<2x512xbf16>
    %c0_1 = arith.constant 0 : index
    %c0_2 = arith.constant 0 : index
    %2 = vector.load %arg2[%c0_1, %c0_2] : memref<64x2xf32, #tpu.memory_space<vmem>>, vector<64x2xf32>
    %3 = arith.truncf %2 : vector<64x2xf32> to vector<64x2xbf16>
    %cst = arith.constant dense<0.000000e+00> : vector<64x512xf32>
    %4 = tpu.matmul %3, %1, %cst {dimension_numbers = #tpu.dot_dimension_numbers<[1], [0], [0], [1], [0, 0, 1, 1], [], []>} : vector<64x2xbf16>, vector<2x512xbf16>, vector<64x512xf32> -> vector<64x512xf32>
    %c0_3 = arith.constant 0 : index
    %c0_4 = arith.constant 0 : index
    %5 = vector.load %arg3[%c0_3, %c0_4] : memref<64x1xf32, #tpu.memory_space<vmem>>, vector<64x1xf32>
    %6 = vector.broadcast %5 : vector<64x1xf32> to vector<64x512xf32>
    %7 = arith.addf %4, %6 : vector<64x512xf32>
    %cst_5 = arith.constant 0.000000e+00 : f32
    %8 = vector.broadcast %cst_5 : f32 to vector<64x512xf32>
    %9 = arith.maximumf %7, %8 : vector<64x512xf32>
    %c0_6 = arith.constant 0 : index
    %c0_7 = arith.constant 0 : index
    %10 = vector.load %arg4[%c0_6, %c0_7] : memref<32x64xf32, #tpu.memory_space<vmem>>, vector<32x64xf32>
    %11 = arith.truncf %10 : vector<32x64xf32> to vector<32x64xbf16>
    %12 = arith.truncf %9 : vector<64x512xf32> to vector<64x512xbf16>
    %cst_8 = arith.constant dense<0.000000e+00> : vector<32x512xf32>
    %13 = tpu.matmul %11, %12, %cst_8 {dimension_numbers = #tpu.dot_dimension_numbers<[1], [0], [0], [1], [0, 0, 1, 1], [], []>} : vector<32x64xbf16>, vector<64x512xbf16>, vector<32x512xf32> -> vector<32x512xf32>
    %c0_9 = arith.constant 0 : index
    %c0_10 = arith.constant 0 : index
    %14 = vector.load %arg5[%c0_9, %c0_10] : memref<32x1xf32, #tpu.memory_space<vmem>>, vector<32x1xf32>
    %15 = vector.broadcast %14 : vector<32x1xf32> to vector<32x512xf32>
    %16 = arith.addf %13, %15 : vector<32x512xf32>
    %cst_11 = arith.constant 0.000000e+00 : f32
    %17 = vector.broadcast %cst_11 : f32 to vector<32x512xf32>
    %18 = arith.maximumf %16, %17 : vector<32x512xf32>
    %c0_12 = arith.constant 0 : index
    %c0_13 = arith.constant 0 : index
    %19 = vector.load %arg6[%c0_12, %c0_13] : memref<32x1xf32, #tpu.memory_space<vmem>>, vector<32x1xf32>
    %20 = vector.broadcast %19 : vector<32x1xf32> to vector<32x512xf32>
    %21 = arith.mulf %18, %20 : vector<32x512xf32>
    %cst_14 = arith.constant dense<0.000000e+00> : vector<512xf32>
    %22 = vector.multi_reduction <add>, %21, %cst_14 [0] : vector<32x512xf32> to vector<512xf32>
    %23 = vector.shape_cast %22 : vector<512xf32> to vector<1x512xf32>
    %c0_15 = arith.constant 0 : index
    %c0_16 = arith.constant 0 : index
    %24 = memref.load %arg7[%c0_15, %c0_16] : memref<1x1xf32, #tpu.memory_space<smem>>
    %25 = vector.broadcast %24 : f32 to vector<1x512xf32>
    %26 = arith.addf %23, %25 : vector<1x512xf32>
    %cst_17 = arith.constant 5.000000e-01 : f32
    %27 = vector.broadcast %cst_17 : f32 to vector<1x512xf32>
    %28 = arith.mulf %27, %26 : vector<1x512xf32>
    %29 = math.tanh %28 : vector<1x512xf32>
    %cst_18 = arith.constant 5.000000e-01 : f32
    %30 = vector.broadcast %cst_18 : f32 to vector<1x512xf32>
    %31 = arith.mulf %30, %29 : vector<1x512xf32>
    %cst_19 = arith.constant 5.000000e-01 : f32
    %32 = vector.broadcast %cst_19 : f32 to vector<1x512xf32>
    %33 = arith.addf %31, %32 : vector<1x512xf32>
    %c0_20 = arith.constant 0 : index
    %c0_21 = arith.constant 0 : index
    %34 = vector.load %arg8[%c0_20, %c0_21] : memref<1x512xf32, #tpu.memory_space<vmem>>, vector<1x512xf32>
    tpu.vector_store %arg8[%c0_20, %c0_21], %33 {strides = array<i32>} : memref<1x512xf32, #tpu.memory_space<vmem>>, vector<1x512xf32>,
    return
  }
  func.func @transform_0(%arg0: i32) -> (i32, i32) {
    %c0_i32 = arith.constant 0 : i32
    %c0_i32_0 = arith.constant 0 : i32
    return %c0_i32, %arg0 : i32, i32
  }
  func.func @transform_1(%arg0: i32) -> (i32, i32) {
    %c0_i32 = arith.constant 0 : i32
    %c0_i32_0 = arith.constant 0 : i32
    %c0_i32_1 = arith.constant 0 : i32
    return %c0_i32, %c0_i32_0 : i32, i32
  }
  func.func @transform_2(%arg0: i32) -> (i32, i32) {
    %c0_i32 = arith.constant 0 : i32
    %c0_i32_0 = arith.constant 0 : i32
    %c0_i32_1 = arith.constant 0 : i32
    return %c0_i32, %c0_i32_0 : i32, i32
  }
  func.func @transform_3(%arg0: i32) -> (i32, i32) {
    %c0_i32 = arith.constant 0 : i32
    %c0_i32_0 = arith.constant 0 : i32
    %c0_i32_1 = arith.constant 0 : i32
    return %c0_i32, %c0_i32_0 : i32, i32
  }
  func.func @transform_4(%arg0: i32) -> (i32, i32) {
    %c0_i32 = arith.constant 0 : i32
    %c0_i32_0 = arith.constant 0 : i32
    %c0_i32_1 = arith.constant 0 : i32
    return %c0_i32, %c0_i32_0 : i32, i32
  }
  func.func @transform_5(%arg0: i32) -> (i32, i32) {
    %c0_i32 = arith.constant 0 : i32
    %c0_i32_0 = arith.constant 0 : i32
    %c0_i32_1 = arith.constant 0 : i32
    return %c0_i32, %c0_i32_0 : i32, i32
  }
  func.func @transform_6(%arg0: i32) -> (i32, i32) {
    %c0_i32 = arith.constant 0 : i32
    %c0_i32_0 = arith.constant 0 : i32
    %c0_i32_1 = arith.constant 0 : i32
    return %c0_i32, %c0_i32_0 : i32, i32
  }
  func.func @transform_7(%arg0: i32) -> (i32, i32) {
    %c0_i32 = arith.constant 0 : i32
    %c0_i32_0 = arith.constant 0 : i32
    return %c0_i32, %arg0 : i32, i32
  }
}

</mosaic_0001>

<bundles_post_ra>
// kernel: tpu_custom_call.1
= control target key start
LH: loop header
LB: loop body
LE: loop exit
PB: predicated region body
PF: predicated region fallthrough
CT: control target
= control target key end

     0   :  { %s1420_s0 = inlined_call_operand.vmem [shape: f32[2,1000], index: 0, kind: input, shape index: {}]   ;;  %s1421_s1 = inlined_call_operand.vmem [shape: f32[64,2], index: 1, kind: input, shape index: {}]   ;;  %s1422_s2 = inlined_call_operand.vmem [shape: f32[64,1], index: 2, kind: input, shape index: {}]   ;;  %s1423_s3 = inlined_call_operand.vmem [shape: f32[32,64], index: 3, kind: input, shape index: {}]   ;;  %s1424_s4 = inlined_call_operand.vmem [shape: f32[32,1], index: 4, kind: input, shape index: {}]   ;;  %s1425_s5 = inlined_call_operand.vmem [shape: f32[32,1], index: 5, kind: input, shape index: {}]   ;;  %s1426_s6 = inlined_call_operand.<no memory space> [shape: f32[1,1], index: 6, kind: input, shape index: {}]   ;;  %s1427_s7 = inlined_call_operand.hbm [shape: f32[1,1000], index: 7, kind: output, shape index: {}]  }
   0x1   :  { %12 = sst [smem:[#allocation2]] %s1426_s6 }
   0x2   :  { %13 = vsyncpa [#allocation4], 0 }
   0x3   :  { %15 = vsyncpa [#allocation4 + $0x1], 0  ;;  %s1143_s26 = smov 0   ;;  %s1145_s27 = smov 0  }
   0x4   :  { %s1147_s28 = smov 0   ;;  %s1149_s29 = smov 0  }
   0x5 LB: > { %s1164_s6 = sadd.s32 4294967295, %s1094_s29   ;;  %s954_s30 = sadd.s32 4294967294, %s1094_s29   ;;  %s1094_s29 = sphi %s1149_s29, %s1433_s29   ;;  %s1090_s28 = sphi %s1147_s28, %s1432_s28   ;;  %s1086_s27 = sphi %s1145_s27, %s1431_s27   ;;  %s1082_s26 = sphi %s1143_s26, %s1430_s26  }
   0x6   : > { %s1168_s8 = sadd.s32 1, %s1094_s29   ;;  %s180_s9 = sadd.s32 1, %s1090_s28 }
   0x7   : > { %s177_s10 = ssub.s32 %s1094_s29, %s1168_s8  ;;  %p190_p0 = scmp.ne.s32.totalorder %s1090_s28, %s1086_s27 }
   0x8   : > { %p178_p1 = scmp.eq.s32.totalorder %s177_s10, 0  ;;  %p191_p2 = scmp.eq.s32.totalorder %s1164_s6, 1 }
   0x9   : > { %p196_p3 = scmp.ne.s32.totalorder %s1086_s27, %s1082_s26  ;;  %p197_p4 = scmp.eq.s32.totalorder %s954_s30, 1 }
   0xa   : > { %s1179_s11 = scalar_select %p178_p1, %s1090_s28, %s180_s9  }
   0xb   : > { %p1181_p5 = por %p191_p2, %p190_p0  ;;  %p1185_p6 = por %p197_p4, %p196_p3 }
   0xc   : > { %p957_p7 = scmp.ge.s32.totalorder %s1094_s29, 1  ;;  %p242_p8 = scmp.lt.s32.totalorder %s1094_s29, 3 }
   0xe   : > { %p243_p9 = pnand %p957_p7, %p242_p8 }
   0xf   : > { %s959_s14 = sshll.u32 (!%p243_p9), %s1164_s6, 2  ;;  %s824_s15 = sld [smem:[#allocation2]] (!%p243_p9) }
  0x10   : > { %246 = sbr.rel (%p243_p9) target bundleno = 555 (0x22b), region = 48  ;;  %p275_p10 = scmp.lt.s32.totalorder (!%p243_p9), %s959_s14, 7 }
  0x11   : > { %s271_s16 = sand.u32 (!%p243_p9), 1, %s1086_s27   ;;  %s980_s18 = sshll.u32 (!%p243_p9), %s1164_s6, 6 }
  0x12   : > { %s958_s17 = sshll.u32 (!%p243_p9), %s271_s16, 2  ;;  %s893_s23 = scalar_lea.hbm (!%p243_p9), %s1427_s7, %s980_s18 }
  0x13   : > { %s1099_s30 = smov (!%p243_p9), [#allocation3]  }
  0x14   : > { %s1038_s6 = sshll.u32 (!%p243_p9), %s1099_s30, 4  ;;  %s1039_s6 = int_to_ptr.vmem [resolvable:$false] %s1038_s6 }
  0x15   : > { %v288_v0 = vlaneseq  ;;  %v1096_v1 = vmov 1983009808   ;;  %v1097_v4 = vmov 0   ;;  %s1435_s14 = smov (!%p275_p10, %s959_s14), 7  ;;  %v327_v6 = vld [vmem:[%s1422_s2 + $0x30] sm:$0xff]  ;;  %v325_v7 = vld [vmem:[%s1422_s2 + $0x20] sm:$0xff] }
  0x16   : > { %v286_v2 = vunpack.c.l.s4 %v1096_v1  ;;  %427 = vmatprep.mubr.bf16.mxu0 %v1097_v4  ;;  %500 = vmatprep.mubr.bf16.mxu1 %v1097_v4  ;;  %s960_s19 = sshll.u32 %s1435_s14, 1  ;;  %v328_v9 = vld [vmem:[%s1422_s2 + $0x38] sm:$0xff]  ;;  %v326_v10 = vld [vmem:[%s1422_s2 + $0x28] sm:$0xff]  ;;  %vm382_vm0 = vcmask 1040384   ;;  %v323_v14 = vld [vmem:[%s1422_s2 + $0x10] sm:$0xff]  ;;  %vm369_vm1 = vcmask 15360  }
  0x17   : > { %v1193_v3 = vshrl.u32 %v288_v0, 7  ;;  %1023 = vset.pattern.permute.xlu0 %v1097_v4  ;;  %1024 = vset.pattern.permute.xlu1 %v1097_v4  ;;  %s278_s24 = scalar_lea.vmem %s1420_s0, %s960_s19  ;;  %v324_v18 = vld [vmem:[%s1422_s2 + $0x18] sm:$0xff]  ;;  %v309_v19 = vld [vmem:[%s1421_s1] sm:$0xff]  ;;  %v310_v20 = vld [vmem:[%s1421_s1 + $0x8] sm:$0xff]  ;;  %vm619_vm2 = vcmask 523264   ;;  %s273_s19 = scalar_lea.vmem [#allocation3], %s958_s17 }
  0x18   : > { %v287_v5 = vunpack.c.0.s8 %v286_v2  ;;  %361 = vperm.xlu0 %1023, %v327_v6   ;;  %351 = vperm.xlu1 %1024, %v325_v7   ;;  %v282_v11 = vld [vmem:[%s278_s24] sm:$0xff]  ;;  %v317_v28 = vpack.c.bf16 %v310_v20, %v309_v19  ;;  %v322_v29 = vld [vmem:[%s1422_s2 + $0x8] sm:$0xff]  ;;  %v311_v32 = vld [vmem:[%s1421_s1 + $0x10] sm:$0xff]  ;;  %s895_s20 = sshll.u32 %s273_s19, 4  ;;  %vm877_vm3 = vcmp.lt.s32.totalorder %v288_v0, 512  ;;  %s881_s24 = scalar_lea.sflag [#allocation4], %s271_s16  ;;  %s896_s20 = int_to_ptr.vmem [resolvable:$true] %s895_s20 }
  0x19   : > { %v284_v13 = vcombine.high %v282_v11, %v282_v11  ;;  %v321_v25 = vld [vmem:[%s1422_s2] sm:$0xff]  ;;  %v596_v31 = vld [vmem:[%s1424_s4 + $0x8] sm:$0xff]  ;;  %v312_v33 = vld [vmem:[%s1421_s1 + $0x18] sm:$0xff]  ;;  %s1034_s25 = scalar_lea.vmem %s896_s20, 64  ;;  %s1040_s9 = scalar_lea.vmem %s1039_s6, 128 }
  0x1a   : > { %v290_v8 = vsub.s32 %v287_v5, %v1193_v3  ;;  %v595_v30 = vld [vmem:[%s1424_s4] sm:$0xff]  ;;  %v597_v34 = vld [vmem:[%s1424_s4 + $0x10] sm:$0xff]  ;;  %v318_v35 = vpack.c.bf16 %v312_v33, %v311_v32  ;;  %v598_v36 = vld [vmem:[%s1424_s4 + $0x18] sm:$0xff]  ;;  %p1035_p11 = scmp.ne.s32.totalorder %s896_s20, %s1034_s25  ;;  %p1041_p0 = scmp.lt.s32.totalorder %s896_s20, %s1039_s6 }
  0x1b   : > { %v748_v37 = vld [vmem:[%s1425_s5] sm:$0xff]  ;;  %v749_v38 = vld [vmem:[%s1425_s5 + $0x8] sm:$0xff]  ;;  %v750_v41 = vld [vmem:[%s1425_s5 + $0x10] sm:$0xff]  ;;  %p1042_p1 = scmp.lt.s32.totalorder %s1040_s9, %s1034_s25 }
  0x1c   : > { %v291_v12 = vrot.slane %v282_v11, %v290_v8  ;;  %366 = vperm.xlu0 %1023, %v328_v9   ;;  %356 = vperm.xlu1 %1024, %v326_v10   ;;  %v298_v17 = vrot.slane %v284_v13, %v290_v8  ;;  %v313_v39 = vld [vmem:[%s1421_s1 + $0x20] sm:$0xff]  ;;  %v314_v40 = vld [vmem:[%s1421_s1 + $0x28] sm:$0xff]  ;;  %v751_v43 = vld [vmem:[%s1425_s5 + $0x18] sm:$0xff]  ;;  %p1036_p12 = pnand %p1035_p11, %p1181_p5 }
  0x1d   : > { %v319_v42 = vpack.c.bf16 %v314_v40, %v313_v39  ;;  %v315_v44 = vld [vmem:[%s1421_s1 + $0x30] sm:$0xff]  ;;  %v316_v45 = vld [vmem:[%s1421_s1 + $0x38] sm:$0xff]  ;;  %p1043_p2 = por %p1042_p1, %p1041_p0 }
  0x1e   : > { %v299_v15 = vcombine.high %v291_v12, %v291_v12  ;;  %v305_v16 = vpack.c.bf16 %v291_v12, %v291_v12  ;;  %v300_v23 = vcombine.high %v298_v17, %v298_v17  ;;  %v307_v24 = vpack.c.bf16 %v298_v17, %v298_v17  ;;  %p1037_p13 = pneg %p1036_p12 }
  0x1f   : > { %v320_v46 = vpack.c.bf16 %v316_v45, %v315_v44 }
  0x20   : > { %v306_v21 = vpack.c.bf16 %v299_v15, %v299_v15  ;;  %v384_v22 = vsel %vm382_vm0, %v305_v16, 0  ;;  %341 = vperm.xlu0 %1023, %v323_v14   ;;  %346 = vperm.xlu1 %1024, %v324_v18   ;;  %v308_v26 = vpack.c.bf16 %v300_v23, %v300_v23  ;;  %v390_v27 = vsel %vm382_vm0, %v307_v24, 0  ;;  %p1044_p3 = pnand %p1043_p2, %p1037_p13 }
  0x22   : > { %961 = vmatprep.subr.msk.bf16.mxu0 %vm382_vm0, %v306_v21  ;;  %966 = vmatprep.subr.msk.bf16.mxu1 %vm382_vm0, %v308_v26 }
  0x23   : > { %410 = vmatpush1.bf16.msra.mxu0 %v384_v22  ;;  %483 = vmatpush1.bf16.msra.mxu1 %v390_v27 }
  0x24   : > { %331 = vperm.xlu0 %1023, %v321_v25   ;;  %336 = vperm.xlu1 %1024, %v322_v29  }
  0x26   : > { %962 = vmatmul.mubr.msk.bf16.vlgmr.msra.gmra.mxu0 %vm369_vm1, %v317_v28  ;;  %967 = vmatmul.mubr.msk.bf16.vlgmr.msra.gmra.mxu1 %vm369_vm1, %v317_v28 }
  0x27   : > { %437 = vmatprep.mubr.bf16.mxu0 %v1097_v4  ;;  %510 = vmatprep.mubr.bf16.mxu1 %v1097_v4 }
  0x28   : > { %601 = vperm.xlu0 %1023, %v595_v30   ;;  %606 = vperm.xlu1 %1024, %v596_v31  }
  0x2c   : > { %611 = vperm.xlu0 %1023, %v597_v34   ;;  %616 = vperm.xlu1 %1024, %v598_v36  }
  0x2e   : > { %963 = vmatmul.mubr.msk.bf16.gmra.mxu0 %vm369_vm1, %v318_v35  ;;  %968 = vmatmul.mubr.msk.bf16.gmra.mxu1 %vm369_vm1, %v318_v35 }
  0x2f   : > { %447 = vmatprep.mubr.bf16.mxu0 %v1097_v4  ;;  %520 = vmatprep.mubr.bf16.mxu1 %v1097_v4 }
  0x30   : > { %754 = vperm.xlu0 %1023, %v748_v37   ;;  %759 = vperm.xlu1 %1024, %v749_v38  }
  0x34   : > { %764 = vperm.xlu0 %1023, %v750_v41   ;;  %769 = vperm.xlu1 %1024, %v751_v43  }
  0x36   : > { %964 = vmatmul.mubr.msk.bf16.gmra.mxu0 %vm369_vm1, %v319_v42  ;;  %969 = vmatmul.mubr.msk.bf16.gmra.mxu1 %vm369_vm1, %v319_v42 }
  0x37   : > { %457 = vmatprep.mubr.bf16.mxu0 %v1097_v4  ;;  %530 = vmatprep.mubr.bf16.mxu1 %v1097_v4 }
  0x3e   : > { %965 = vmatmul.mubr.msk.bf16.gmra.mxu0 %vm369_vm1, %v320_v46  ;;  %970 = vmatmul.mubr.msk.bf16.gmra.mxu1 %vm369_vm1, %v320_v46 }
  0x3f   : > { %658 = vmatprep.mubr.bf16.mxu0 %v1097_v4  ;;  %711 = vmatprep.mubr.bf16.mxu1 %v1097_v4 }
  0x93   : > { %v362_v52 = vpop.permute.xlu0 %361  ;;  %v1299_v53 = vpop.permute.xlu1 %351 }
  0x97   : > { %v367_v60 = vpop.permute.xlu0 %366  ;;  %v357_v61 = vpop.permute.xlu1 %356 }
  0x9b   : > { %v1309_v7 = vpop.permute.xlu0 %341  ;;  %v1311_v8 = vpop.permute.xlu1 %346 }
  0x9f   : > { %v1313_v15 = vpop.permute.xlu0 %331  ;;  %v1315_v16 = vpop.permute.xlu1 %336 }
  0xe6   : > { %v429_v47 = vpop.f32.mrf.mxu0  ;;  %v1295_v49 = vpop.f32.mrf.mxu1 }
  0xe7   : > { %v1321_v22 = vadd.f32 %v429_v47, %v1313_v15 }
  0xe8   : > { %v431_v48 = vpop.f32.mrf.mxu0  ;;  %v1297_v51 = vpop.f32.mrf.mxu1 }
  0xe9   : > { %v1318_v21 = vadd.f32 %v431_v48, %v1313_v15 }
  0xea   : > { %v433_v50 = vpop.f32.mrf.mxu0  ;;  %v1301_v55 = vpop.f32.mrf.mxu1 }
  0xeb   : > { %v1324_v23 = vadd.f32 %v433_v50, %v1315_v16 }
  0xec   : > { %v435_v54 = vpop.f32.mrf.mxu0  ;;  %v1303_v57 = vpop.f32.mrf.mxu1 }
  0xed   : > { %v1327_v24 = vadd.f32 %v435_v54, %v1315_v16 }
  0xee   : > { %v439_v56 = vpop.f32.mrf.mxu0  ;;  %v1305_v59 = vpop.f32.mrf.mxu1 }
  0xef   : > { %v1330_v25 = vadd.f32 %v439_v56, %v1309_v7 }
  0xf0   : > { %v441_v58 = vpop.f32.mrf.mxu0  ;;  %v514_v63 = vpop.f32.mrf.mxu1 }
  0xf1   : > { %v1333_v26 = vadd.f32 %v441_v58, %v1309_v7  ;;  %v1339_v28 = vadd.f32 %v514_v63, %v1309_v7 }
  0xf2   : > { %v443_v62 = vpop.f32.mrf.mxu0  ;;  %v1307_v2 = vpop.f32.mrf.mxu1 }
  0xf3   : > { %v1336_v27 = vadd.f32 %v443_v62, %v1311_v8 }
  0xf4   : > { %v445_v1 = vpop.f32.mrf.mxu0  ;;  %v518_v6 = vpop.f32.mrf.mxu1 }
  0xf5   : > { %v446_v31 = vadd.f32 %v445_v1, %v1311_v8  ;;  %v1344_v36 = vadd.f32 %v518_v6, %v1311_v8 }
  0xf6   : > { %v449_v5 = vpop.f32.mrf.mxu0  ;;  %v522_v10 = vpop.f32.mrf.mxu1 }
  0xf7   : > { %v450_v35 = vadd.f32 %v449_v5, %v1299_v53 }
  0xf8   : > { %v451_v9 = vpop.f32.mrf.mxu0  ;;  %v524_v12 = vpop.f32.mrf.mxu1 }
  0xf9   : > { %v452_v37 = vadd.f32 %v451_v9, %v1299_v53  ;;  %v525_v46 = vadd.f32 %v524_v12, %v1299_v53 }
  0xfa   : > { %v453_v11 = vpop.f32.mrf.mxu0  ;;  %v526_v14 = vpop.f32.mrf.mxu1 }
  0xfb   : > { %v454_v45 = vadd.f32 %v453_v11, %v357_v61  ;;  %v558_v63 = vmax.f32 %v452_v37, 0.0  ;;  %v527_v1 = vadd.f32 %v526_v14, %v357_v61 }
  0xfc   : > { %v455_v13 = vpop.f32.mrf.mxu0  ;;  %v528_v18 = vpop.f32.mrf.mxu1 }
  0xfd   : > { %v456_v32 = vadd.f32 %v455_v13, %v357_v61  ;;  %v529_v41 = vadd.f32 %v528_v18, %v357_v61  ;;  %v561_v11 = vmax.f32 %v454_v45, 0.0  ;;  %v557_v61 = vmax.f32 %v450_v35, 0.0 }
  0xfe   : > { %v459_v17 = vpop.f32.mrf.mxu0  ;;  %v532_v20 = vpop.f32.mrf.mxu1  ;;  %v563_v14 = vmax.f32 %v527_v1, 0.0  ;;  %v505_v35 = vadd.f32 %v1297_v51, %v1313_v15  ;;  %v503_v51 = vadd.f32 %v1295_v49, %v1313_v15  ;;  %v574_v49 = vld [vmem:[%s1423_s3 + $0x8] sm:$0xff] }
  0xff   : > { %v460_v38 = vadd.f32 %v459_v17, %v362_v52  ;;  %v533_v47 = vadd.f32 %v532_v20, %v362_v52  ;;  %v562_v54 = vmax.f32 %v456_v32, 0.0  ;;  %v564_v9 = vmax.f32 %v529_v41, 0.0 }
 0x100   : > { %v461_v19 = vpop.f32.mrf.mxu0  ;;  %v534_v30 = vpop.f32.mrf.mxu1  ;;  %v560_v20 = vmax.f32 %v525_v46, 0.0 }
 0x101   : > { %v462_v33 = vadd.f32 %v461_v19, %v362_v52  ;;  %v535_v42 = vadd.f32 %v534_v30, %v362_v52  ;;  %v565_v5 = vmax.f32 %v460_v38, 0.0  ;;  %v523_v19 = vadd.f32 %v522_v10, %v1299_v53 }
 0x102   : > { %v463_v29 = vpop.f32.mrf.mxu0  ;;  %v536_v40 = vpop.f32.mrf.mxu1  ;;  %v554_v52 = vmax.f32 %v446_v31, 0.0  ;;  %v588_v30 = vpack.c.bf16 %v562_v54, %v558_v63  ;;  %v550_v53 = vmax.f32 %v1333_v26, 0.0  ;;  %v556_v10 = vmax.f32 %v1344_v36, 0.0 }
 0x103   : > { %v464_v34 = vadd.f32 %v463_v29, %v367_v60  ;;  %v537_v44 = vadd.f32 %v536_v40, %v367_v60  ;;  %v566_v56 = vmax.f32 %v462_v33, 0.0  ;;  %v568_v13 = vmax.f32 %v535_v42, 0.0 }
 0x104   : > { %v465_v39 = vpop.f32.mrf.mxu0  ;;  %v538_v50 = vpop.f32.mrf.mxu1  ;;  %v567_v29 = vmax.f32 %v533_v47, 0.0  ;;  %v590_v37 = vpack.c.bf16 %v564_v9, %v560_v20  ;;  %v513_v31 = vadd.f32 %v1305_v59, %v1309_v7  ;;  %v553_v38 = vmax.f32 %v1336_v27, 0.0 }
 0x105   : > { %v466_v43 = vadd.f32 %v465_v39, %v367_v60  ;;  %v569_v48 = vmax.f32 %v464_v34, 0.0  ;;  %v539_v62 = vadd.f32 %v538_v50, %v367_v60  ;;  %v571_v6 = vmax.f32 %v537_v44, 0.0  ;;  %v576_v50 = vld [vmem:[%s1423_s3 + $0x18] sm:$0xff] }
 0x106   : > { %v517_v60 = vadd.f32 %v1307_v2, %v1311_v8  ;;  %v509_v34 = vadd.f32 %v1303_v57, %v1315_v16  ;;  %v559_v2 = vmax.f32 %v523_v19, 0.0  ;;  %v587_v8 = vpack.c.bf16 %v561_v11, %v557_v61 }
 0x107   : > { %v570_v58 = vmax.f32 %v466_v43, 0.0  ;;  %v572_v18 = vmax.f32 %v539_v62, 0.0  ;;  %v591_v12 = vpack.c.bf16 %v569_v48, %v565_v5  ;;  %v593_v33 = vpack.c.bf16 %v571_v6, %v567_v29 }
 0x108   : > { %v546_v57 = vmax.f32 %v1327_v24, 0.0  ;;  %v552_v26 = vmax.f32 %v1339_v28, 0.0  ;;  %v584_v39 = vpack.c.bf16 %v554_v52, %v550_v53  ;;  %v507_v36 = vadd.f32 %v1301_v55, %v1315_v16 }
 0x109   : > { %v592_v17 = vpack.c.bf16 %v570_v58, %v566_v56  ;;  %v594_v32 = vpack.c.bf16 %v572_v18, %v568_v13  ;;  %v549_v40 = vmax.f32 %v1330_v25, 0.0  ;;  %v555_v59 = vmax.f32 %v517_v60, 0.0  ;;  %v602_v56 = vpop.permute.xlu0 %601  ;;  %v607_v58 = vpop.permute.xlu1 %606 }
 0x10a   : > { %v589_v7 = vpack.c.bf16 %v563_v14, %v559_v2  ;;  %v542_v27 = vmax.f32 %v1318_v21, 0.0  ;;  %v548_v41 = vmax.f32 %v509_v34, 0.0  ;;  %v586_v42 = vpack.c.bf16 %v556_v10, %v552_v26  ;;  %v573_v21 = vld [vmem:[%s1423_s3] sm:$0xff] }
 0x10b   : > { %634 = vmatprep.subr.bf16.mxu0 %v592_v17  ;;  %687 = vmatprep.subr.bf16.mxu1 %v594_v32  ;;  %v545_v24 = vmax.f32 %v1324_v23, 0.0  ;;  %v551_v28 = vmax.f32 %v513_v31, 0.0  ;;  %v583_v43 = vpack.c.bf16 %v553_v38, %v549_v40  ;;  %v544_v44 = vmax.f32 %v505_v35, 0.0 }
 0x10c   : > { %635 = vmatpush1.bf16.msra.mxu0 %v591_v12  ;;  %688 = vmatpush1.bf16.msra.mxu1 %v593_v33  ;;  %v580_v55 = vpack.c.bf16 %v546_v57, %v542_v27  ;;  %v541_v16 = vmax.f32 %v1321_v22, 0.0  ;;  %v547_v25 = vmax.f32 %v507_v36, 0.0  ;;  %v543_v23 = vmax.f32 %v503_v51, 0.0  ;;  %v575_v22 = vld [vmem:[%s1423_s3 + $0x10] sm:$0xff] }
 0x10d   : > { %636 = vmatprep.subr.bf16.mxu0 %v588_v30  ;;  %689 = vmatprep.subr.bf16.mxu1 %v590_v37  ;;  %v585_v45 = vpack.c.bf16 %v555_v59, %v551_v28  ;;  %v582_v15 = vpack.c.bf16 %v548_v41, %v544_v44  ;;  %v577_v47 = vpack.c.bf16 %v574_v49, %v573_v21  ;;  %v612_v62 = vpop.permute.xlu0 %611  ;;  %v617_v9 = vpop.permute.xlu1 %616 }
 0x10e   : > { %v579_v46 = vpack.c.bf16 %v545_v24, %v541_v16  ;;  %v581_v48 = vpack.c.bf16 %v547_v25, %v543_v23  ;;  %v578_v54 = vpack.c.bf16 %v576_v50, %v575_v22 }
 0x110   : > { %637 = vmatpush1.bf16.msra.mxu0 %v587_v8  ;;  %690 = vmatpush1.bf16.msra.mxu1 %v589_v7 }
 0x111   : > { %638 = vmatprep.subr.bf16.mxu0 %v584_v39  ;;  %691 = vmatprep.subr.bf16.mxu1 %v586_v42  ;;  %v755_v11 = vpop.permute.xlu0 %754  ;;  %v760_v53 = vpop.permute.xlu1 %759 }
 0x114   : > { %639 = vmatpush1.bf16.msra.mxu0 %v583_v43  ;;  %692 = vmatpush1.bf16.msra.mxu1 %v585_v45 }
 0x115   : > { %640 = vmatprep.subr.bf16.mxu0 %v580_v55  ;;  %693 = vmatprep.subr.bf16.mxu1 %v582_v15  ;;  %v765_v26 = vpop.permute.xlu0 %764  ;;  %v770_v22 = vpop.permute.xlu1 %769 }
 0x118   : > { %641 = vmatpush1.bf16.msra.mxu0 %v579_v46  ;;  %694 = vmatpush1.bf16.msra.mxu1 %v581_v48 }
 0x11b   : > { %971 = vmatmul.mubr.msk.bf16.vlgmr.msra.gmra.mxu0 %vm619_vm2, %v577_v47  ;;  %973 = vmatmul.mubr.msk.bf16.vlgmr.msra.gmra.mxu1 %vm619_vm2, %v577_v47 }
 0x11c   : > { %668 = vmatprep.mubr.bf16.mxu0 %v1097_v4  ;;  %721 = vmatprep.mubr.bf16.mxu1 %v1097_v4 }
 0x123   : > { %972 = vmatmul.mubr.msk.bf16.gmra.mxu0 %vm619_vm2, %v578_v54  ;;  %974 = vmatmul.mubr.msk.bf16.gmra.mxu1 %vm619_vm2, %v578_v54 }
 0x1db   : > { %v660_v63 = vpop.f32.mrf.mxu0  ;;  %v713_v6 = vpop.f32.mrf.mxu1 }
 0x1dc   : > { %v661_v1 = vadd.f32 %v660_v63, %v602_v56  ;;  %v714_v17 = vadd.f32 %v713_v6, %v602_v56 }
 0x1dd   : > { %v662_v5 = vpop.f32.mrf.mxu0  ;;  %v715_v19 = vpop.f32.mrf.mxu1 }
 0x1de   : > { %v663_v13 = vadd.f32 %v662_v5, %v602_v56  ;;  %v732_v12 = vmax.f32 %v661_v1, 0.0  ;;  %v716_v52 = vadd.f32 %v715_v19, %v602_v56  ;;  %v734_v61 = vmax.f32 %v714_v17, 0.0 }
 0x1df   : > { %v664_v18 = vpop.f32.mrf.mxu0  ;;  %v717_v20 = vpop.f32.mrf.mxu1 }
 0x1e0   : > { %v665_v29 = vadd.f32 %v664_v18, %v607_v58  ;;  %v733_v60 = vmax.f32 %v663_v13, 0.0  ;;  %v718_v14 = vadd.f32 %v717_v20, %v607_v58  ;;  %v735_v10 = vmax.f32 %v716_v52, 0.0 }
 0x1e1   : > { %v666_v4 = vpop.f32.mrf.mxu0  ;;  %v719_v34 = vpop.f32.mrf.mxu1  ;;  %v772_v2 = vmul.f32 %v755_v11, %v732_v12  ;;  %v774_v27 = vmul.f32 %v755_v11, %v734_v61 }
 0x1e2   : > { %v736_v30 = vmax.f32 %v665_v29, 0.0  ;;  %v667_v32 = vadd.f32 %v666_v4, %v607_v58  ;;  %v720_v38 = vadd.f32 %v719_v34, %v607_v58  ;;  %v738_v8 = vmax.f32 %v718_v14, 0.0 }
 0x1e3   : > { %v670_v33 = vpop.f32.mrf.mxu0  ;;  %v723_v57 = vpop.f32.mrf.mxu1  ;;  %v773_v7 = vmul.f32 %v755_v11, %v733_v60  ;;  %v775_v28 = vmul.f32 %v755_v11, %v735_v10 }
 0x1e4   : > { %v737_v37 = vmax.f32 %v667_v32, 0.0  ;;  %v671_v31 = vadd.f32 %v670_v33, %v612_v62  ;;  %v776_v39 = vmul.f32 %v760_v53, %v736_v30  ;;  %v739_v59 = vmax.f32 %v720_v38, 0.0 }
 0x1e5   : > { %v672_v35 = vpop.f32.mrf.mxu0  ;;  %v724_v42 = vadd.f32 %v723_v57, %v612_v62  ;;  %v725_v24 = vpop.f32.mrf.mxu1  ;;  %v778_v43 = vmul.f32 %v760_v53, %v738_v8 }
 0x1e6   : > { %v777_v36 = vmul.f32 %v760_v53, %v737_v37  ;;  %v740_v40 = vmax.f32 %v671_v31, 0.0  ;;  %v673_v41 = vadd.f32 %v672_v35, %v612_v62  ;;  %v779_v16 = vmul.f32 %v760_v53, %v739_v59 }
 0x1e7   : > { %v674_v51 = vpop.f32.mrf.mxu0  ;;  %v742_v45 = vmax.f32 %v724_v42, 0.0  ;;  %v726_v21 = vadd.f32 %v725_v24, %v612_v62  ;;  %v727_v15 = vpop.f32.mrf.mxu1  ;;  %v788_v23 = vadd.f32 %v776_v39, %v772_v2  ;;  %v806_v17 = vadd.f32 %v778_v43, %v774_v27 }
 0x1e8   : > { %v780_v44 = vmul.f32 %v765_v26, %v740_v40  ;;  %v675_v55 = vadd.f32 %v674_v51, %v617_v9  ;;  %v741_v25 = vmax.f32 %v673_v41, 0.0  ;;  %v797_v46 = vadd.f32 %v777_v36, %v773_v7 }
 0x1e9   : > { %v676_v49 = vpop.f32.mrf.mxu0  ;;  %v782_v54 = vmul.f32 %v765_v26, %v742_v45  ;;  %v743_v56 = vmax.f32 %v726_v21, 0.0  ;;  %v728_v58 = vadd.f32 %v727_v15, %v617_v9  ;;  %v729_v63 = vpop.f32.mrf.mxu1  ;;  %v815_v18 = vadd.f32 %v779_v16, %v775_v28 }
 0x1ea   : > { %v744_v47 = vmax.f32 %v675_v55, 0.0  ;;  %v677_v48 = vadd.f32 %v676_v49, %v617_v9  ;;  %v781_v50 = vmul.f32 %v765_v26, %v741_v25  ;;  %v789_v1 = vadd.f32 %v788_v23, %v780_v44 }
 0x1eb   : > { %v730_v13 = vadd.f32 %v729_v63, %v617_v9  ;;  %v783_v19 = vmul.f32 %v765_v26, %v743_v56  ;;  %v746_v62 = vmax.f32 %v728_v58, 0.0  ;;  %v807_v4 = vadd.f32 %v806_v17, %v782_v54 }
 0x1ec   : > { %v784_v5 = vmul.f32 %v770_v22, %v744_v47  ;;  %v745_v6 = vmax.f32 %v677_v48, 0.0  ;;  %v798_v11 = vadd.f32 %v797_v46, %v781_v50  ;;  %v825_v40 = vstv %s824_s15 }
 0x1ed   : > { %v747_v52 = vmax.f32 %v730_v13, 0.0  ;;  %v786_v20 = vmul.f32 %v770_v22, %v746_v62  ;;  %v816_v32 = vadd.f32 %v815_v18, %v783_v19  ;;  %v1098_v23 = vmov 1966171168  }
 0x1ee   : > { %v790_v29 = vadd.f32 %v789_v1, %v784_v5  ;;  %v785_v12 = vmul.f32 %v770_v22, %v745_v6  ;;  %v853_v46 = vunpack.c.l.s4 %v1098_v23 }
 0x1ef   : > { %v787_v61 = vmul.f32 %v770_v22, %v747_v52  ;;  %v808_v14 = vadd.f32 %v807_v4, %v786_v20 }
 0x1f0   : > { %v791_v30 = vrot.slane %v790_v29, 4  ;;  %v799_v60 = vadd.f32 %v798_v11, %v785_v12  ;;  %v854_v54 = vunpack.c.0.s8 %v853_v46 }
 0x1f1   : > { %v817_v53 = vadd.f32 %v816_v32, %v787_v61  ;;  %v809_v9 = vrot.slane %v808_v14, 4 }
 0x1f2   : > { %v792_v33 = vadd.f32 %v791_v30, %v790_v29  ;;  %v800_v34 = vrot.slane %v799_v60, 4  ;;  %v857_v13 = vsub.s32 %v854_v54, %v1193_v3 }
 0x1f3   : > { %v818_v31 = vrot.slane %v817_v53, 4  ;;  %v810_v38 = vadd.f32 %v809_v9, %v808_v14 }
 0x1f4   : > { %v793_v10 = vrot.slane %v792_v33, 2  ;;  %v801_v37 = vadd.f32 %v800_v34, %v799_v60 }
 0x1f5   : > { %v819_v35 = vadd.f32 %v818_v31, %v817_v53  ;;  %v811_v57 = vrot.slane %v810_v38, 2 }
 0x1f6   : > { %v794_v2 = vadd.f32 %v793_v10, %v792_v33  ;;  %v802_v8 = vrot.slane %v801_v37, 2 }
 0x1f7   : > { %v820_v36 = vrot.slane %v819_v35, 2  ;;  %v812_v59 = vadd.f32 %v811_v57, %v810_v38 }
 0x1f8   : > { %v795_v26 = vrot.slane %v794_v2, 1  ;;  %v803_v39 = vadd.f32 %v802_v8, %v801_v37 }
 0x1f9   : > { %v821_v41 = vadd.f32 %v820_v36, %v819_v35  ;;  %v813_v42 = vrot.slane %v812_v59, 1 }
 0x1fa   : > { %v796_v7 = vadd.f32 %v795_v26, %v794_v2  ;;  %v804_v27 = vrot.slane %v803_v39, 1 }
 0x1fb   : > { %v822_v28 = vrot.slane %v821_v41, 1  ;;  %v814_v43 = vadd.f32 %v813_v42, %v812_v59 }
 0x1fc   : > { %v826_v51 = vadd.f32 %v825_v40, %v796_v7  ;;  %v805_v24 = vadd.f32 %v804_v27, %v803_v39 }
 0x1fd   : > { %v823_v16 = vadd.f32 %v822_v28, %v821_v41  ;;  %v828_v25 = vadd.f32 %v825_v40, %v814_v43 }
 0x1fe   : > { %v830_v44 = vmul.f32 0.5, %v826_v51  ;;  %v827_v55 = vadd.f32 %v825_v40, %v805_v24 }
 0x1ff   : > { %v829_v21 = vadd.f32 %v825_v40, %v823_v16  ;;  %v832_v49 = vmul.f32 0.5, %v828_v25 }
 0x200   : > { %1026 = vtanh.f32 %v830_v44  ;;  %v831_v45 = vmul.f32 0.5, %v827_v55 }
 0x201   : > { %v833_v15 = vmul.f32 0.5, %v829_v21 }
 0x202   : > { %1028 = vtanh.f32 %v831_v45 }
 0x203   : > { %1030 = vtanh.f32 %v832_v49 }
 0x204   : > { %1032 = vtanh.f32 %v833_v15 }
 0x20d   : > { %v1027_v47 = vpop.eup %1026 }
 0x20e   : > { %v838_v48 = vmul.f32 0.5, %v1027_v47 }
 0x20f   : > { %v1029_v22 = vpop.eup %1028 }
 0x210   : > { %v1031_v50 = vpop.eup %1030  ;;  %v839_v56 = vmul.f32 0.5, %v1029_v22  ;;  %v842_v5 = vadd.f32 0.5, %v838_v48 }
 0x211   : > { %v1033_v58 = vpop.eup %1032  ;;  %v840_v63 = vmul.f32 0.5, %v1031_v50 }
 0x212   : > { %v841_v1 = vmul.f32 0.5, %v1033_v58  ;;  %v843_v6 = vadd.f32 0.5, %v839_v56 }
 0x213   : > { %v844_v17 = vadd.f32 0.5, %v840_v63 }
 0x214   : > { %v845_v18 = vadd.f32 0.5, %v841_v1  ;;  %v850_v19 = vcombine.low %v842_v5, %v843_v6 }
 0x216   : > { %v851_v62 = vcombine.low %v844_v17, %v845_v18  ;;  %v858_v11 = vrot.slane %v850_v19, %v857_v13 }
 0x218   : > { %v865_v29 = vrot.slane %v851_v62, %v857_v13 }
 0x21a   : > { %v866_v12 = vcombine.low %v858_v11, %v865_v29 }
 0x21c   : > { %v873_v52 = vrot.slane %v866_v12, %v857_v13 }
 0x21e   : > { %879 = vst.msk [vmem:[%s273_s19] sm:$0xf] %vm877_vm3, %v873_v52 }
 0x21f   : > { %1047 = shalt.err (!%p1044_p3)
}
 0x220   : > { %s1048_s10 = scalar_lea.hbm %s893_s23, 64  ;;  %s1052_s16 = scalar_lea.hbm %s1427_s7, 128 }
 0x221   : > { %p1049_p4 = scmp.ne.s32.totalorder %s893_s23, %s1048_s10  ;;  %p1053_p9 = scmp.lt.s32.totalorder %s893_s23, %s1427_s7 }
 0x222   : > { %p1054_p10 = scmp.lt.s32.totalorder %s1052_s16, %s1048_s10 }
 0x223   : > { %p1050_p7 = pnand %p1049_p4, %p1181_p5 }
 0x224   : > { %p1055_p11 = por %p1054_p10, %p1053_p9 }
 0x225   : > { %p1051_p8 = pneg %p1050_p7 }
 0x227   : > { %p1056_p12 = pnand %p1055_p11, %p1051_p8 }
 0x229   : > { %1059 = shalt.err (!%p1056_p12)
}
 0x22a   : > { %981 = dma.vmem_to_hbm [thread:$0]  (%p1181_p5), %s896_s20, 64, %s893_s23, %s881_s24  }
 0x22b PF: > { %p987_p13 = scmp.ge.s32.totalorder %s1094_s29, 2  ;;  %s907_s19 = sand.u32 1, %s1082_s26  }
 0x22c   : > { %s908_s21 = scalar_lea.sflag [#allocation4], %s907_s19 }
 0x22d   : > { %p984_p0 = pnand %p987_p13, %p1185_p6 }
 0x22f   : > { %p985_p1 = pneg %p984_p0 }
 0x231   : > { %1077 = dma.done.wait (%p985_p1), %s908_s21, 64  }
 0x232   : > { %1079 = vsyncadd (%p985_p1), %s908_s21, 4294967232  ;;  %p18_p2 = scmp.ge.s32.totalorder %s1168_s8, 4   ;;  %s1430_s26 = smov %s1086_s27 }
 0x233   : > { %s1431_s27 = smov %s1090_s28  ;;  %s1432_s28 = smov %s1179_s11 }
 0x234   : > { %s1433_s29 = smov %s1168_s8  ;;  %20 = sbr.rel (!%p18_p2) target bundleno = 5 (0x5), region = 83 }
 0x239   :  { %913 = vsyncpa [#allocation4], 1 }
 0x23a   :  { %915 = vsyncpa [#allocation4 + $0x1], 1 }

</bundles_post_ra>
